<compile_context>
chip_gen: v5e
topology: v5e:2x2
jax: 0.10.0
libtpu: 0.0.40
codegen_flags: <defaults>
</compile_context>

<pallas_src>
import functools

import jax
import jax.numpy as jnp
from jax.experimental import pallas as pl
from jax.experimental.pallas import tpu as pltpu

_LANE = 128
_SUBLANE = 8


def _round_up(x, m):
    return (x + m - 1) // m * m


def _leaky_relu(v, slope=0.2):
    # One vmax per vreg (valid for 0 < slope < 1) instead of compare+select.
    return jnp.maximum(v, slope * v)


# ----------------------------------------------------------------------------
# Kernel
# ----------------------------------------------------------------------------
def vae_kernel(
    x_ref,
    w1_ref, b1_ref,        # encoder Linear(in -> H)        (BN folded)
    w2_ref, b2_ref,        # encoder Linear(H -> H/2)       (BN folded)
    wmvd_ref, bmvd_ref,    # [fc_mu || fc_var | fc_mu@dec1] fused (H/2 -> dmv+dh2)
    wd2_ref, bd2_ref,      # decoder Linear(H/2 -> H)       (BN folded)
    wd3_ref, bd3_ref,      # decoder Linear(H -> in)
    recon_ref, mulv_ref,
    *, mv_width,
):
    wt = w1_ref.dtype
    x = x_ref[...].astype(wt)                    # cast to bf16 in-kernel (no wrapper pass)

    # ---- encoder (Dropout = identity in eval mode) ----
    h = jnp.dot(x, w1_ref[...], preferred_element_type=jnp.float32) + b1_ref[...]
    h = _leaky_relu(h)
    h = jnp.dot(h.astype(wt), w2_ref[...], preferred_element_type=jnp.float32) + b2_ref[...]
    h = _leaky_relu(h)

    # ---- one matmul: [mu || logvar | decoder-layer-1 pre-activation] ----
    mvd = jnp.dot(h.astype(wt), wmvd_ref[...], preferred_element_type=jnp.float32) + bmvd_ref[...]
    mulv_ref[...] = mvd[:, :mv_width]            # lane-dense mu||logvar slab

    # ---- decoder (z = mu already folded into wmvd) ----
    d = _leaky_relu(mvd[:, mv_width:])
    d = jnp.dot(d.astype(wt), wd2_ref[...], preferred_element_type=jnp.float32) + bd2_ref[...]
    d = _leaky_relu(d)
    recon_ref[...] = (
        jnp.dot(d.astype(wt), wd3_ref[...], preferred_element_type=jnp.float32) + bd3_ref[...]
    )


# ----------------------------------------------------------------------------
# Parameter construction (mirrors the PyTorch module init) and packing.
# ----------------------------------------------------------------------------
def _kaiming_linear(key, fan_in, fan_out):
    # kaiming_normal_(mode='fan_in', nonlinearity='leaky_relu', a=0):
    # gain = sqrt(2), std = gain / sqrt(fan_in). Stored as (in, out).
    std = (2.0 / fan_in) ** 0.5
    w = std * jax.random.normal(key, (fan_in, fan_out), dtype=jnp.float32)
    b = jnp.zeros((fan_out,), dtype=jnp.float32)
    return w, b


def _bn_eval_scale_shift(dim, eps=1e-5):
    # gamma=1, beta=0, running_mean=0, running_var=1 at init (eval mode).
    gamma = jnp.ones((dim,), jnp.float32)
    beta = jnp.zeros((dim,), jnp.float32)
    running_mean = jnp.zeros((dim,), jnp.float32)
    running_var = jnp.ones((dim,), jnp.float32)
    scale = gamma / jnp.sqrt(running_var + eps)
    shift = beta - running_mean * scale
    return scale, shift


def make_vae_params(key, input_dim, hidden_dim, latent_dim):
    """Logical (un-padded, f32) parameters mirroring the PyTorch module."""
    ks = jax.random.split(key, 7)
    h2 = hidden_dim // 2
    p = {}
    p["w1"], p["b1"] = _kaiming_linear(ks[0], input_dim, hidden_dim)
    p["s1"], p["t1"] = _bn_eval_scale_shift(hidden_dim)
    p["w2"], p["b2"] = _kaiming_linear(ks[1], hidden_dim, h2)
    p["s2"], p["t2"] = _bn_eval_scale_shift(h2)
    p["wmu"], p["bmu"] = _kaiming_linear(ks[2], h2, latent_dim)
    p["wvar"], p["bvar"] = _kaiming_linear(ks[3], h2, latent_dim)
    p["wd1"], p["bd1"] = _kaiming_linear(ks[4], latent_dim, h2)
    p["s3"], p["t3"] = _bn_eval_scale_shift(h2)
    p["wd2"], p["bd2"] = _kaiming_linear(ks[5], h2, hidden_dim)
    p["s4"], p["t4"] = _bn_eval_scale_shift(hidden_dim)
    p["wd3"], p["bd3"] = _kaiming_linear(ks[6], hidden_dim, input_dim)
    return p


def _fold_bn(w, b, scale, shift):
    # BN(xW + b) = x(W * scale) + (b * scale + shift); scale/shift per out-col.
    return w * scale[None, :], b * scale + shift


def _pad2(w, rows, cols):
    return jnp.pad(w, ((0, rows - w.shape[0]), (0, cols - w.shape[1])))


def _pad_bias(b, cols):
    return jnp.pad(b, (0, cols - b.shape[0])).reshape(1, cols)


def prepare_params(p, input_dim, hidden_dim, latent_dim, compute_dtype=jnp.bfloat16):
    """Fold BN + bias, fuse fc_mu/fc_var/decoder[0], zero-pad to lane multiples."""
    h2 = hidden_dim // 2
    di = _round_up(input_dim, _LANE)
    dh = _round_up(hidden_dim, _LANE)
    dh2 = _round_up(h2, _LANE)
    dmv = _round_up(2 * latent_dim, _LANE)       # tight mu||logvar slab width

    w1, b1 = _fold_bn(p["w1"], p["b1"], p["s1"], p["t1"])
    w2, b2 = _fold_bn(p["w2"], p["b2"], p["s2"], p["t2"])
    wd1, bd1 = _fold_bn(p["wd1"], p["bd1"], p["s3"], p["t3"])
    wd2, bd2 = _fold_bn(p["wd2"], p["bd2"], p["s4"], p["t4"])

    # Decoder layer 1 folded through z = mu:  h @ (Wmu @ Wd1') + (bmu @ Wd1' + bd1').
    wmd = p["wmu"] @ wd1                         # (h2, h2)
    bmd = p["bmu"] @ wd1 + bd1                   # (h2,)

    # [ mu || logvar (tight) -> pad to dmv | decoder-layer-1 -> pad to dh2 ]
    wmv = jnp.concatenate([p["wmu"], p["wvar"]], axis=1)       # (h2, 2*latent)
    bmv = jnp.concatenate([p["bmu"], p["bvar"]], axis=0)       # (2*latent,)
    wmvd = jnp.concatenate([_pad2(wmv, h2, dmv), _pad2(wmd, h2, dh2)], axis=1)
    wmvd = _pad2(wmvd, dh2, dmv + dh2)
    bmvd = jnp.concatenate([_pad_bias(bmv, dmv), _pad_bias(bmd, dh2)], axis=1)

    packed = (
        _pad2(w1, input_dim, dh).astype(compute_dtype), _pad_bias(b1, dh),
        _pad2(w2, dh, dh2).astype(compute_dtype), _pad_bias(b2, dh2),
        wmvd.astype(compute_dtype), bmvd,
        _pad2(wd2, dh2, dh).astype(compute_dtype), _pad_bias(bd2, dh),
        _pad2(p["wd3"], dh, di).astype(compute_dtype), _pad_bias(p["bd3"], di),
    )
    return packed


# ----------------------------------------------------------------------------
# Forward wrapper.
# ----------------------------------------------------------------------------
def _pick_batch_tile(b8, cap=512):
    """Multiple-of-8 batch tile: small padding waste, >=2 grid steps when
    b8 >= 16 (v7x megacore), capped at `cap` rows (v6e/v5e step amortization)."""
    target = min(cap, max(_SUBLANE, b8 // 2))
    target -= target % _SUBLANE
    max_waste = max(_SUBLANE, b8 // 8)
    for cand in range(target, _SUBLANE - 1, -_SUBLANE):
        padded = pl.cdiv(b8, cand) * cand
        if padded - b8 <= max_waste:
            return cand
    return _SUBLANE


@functools.partial(jax.jit, static_argnames=("latent_dim",))
def simple_vae_forward(x, packed_params, latent_dim):
    B, input_dim = x.shape
    dh = packed_params[0].shape[1]
    dh2 = packed_params[6].shape[0]
    dmv = packed_params[4].shape[1] - dh2
    di = packed_params[8].shape[1]

    b8 = _round_up(B, _SUBLANE)
    tb = _pick_batch_tile(b8)
    b_pad = pl.cdiv(b8, tb) * tb
    if b_pad != B:
        x = jnp.pad(x, ((0, b_pad - B), (0, 0)))   # batch pad only when needed
    grid = (b_pad // tb,)

    def row_spec(width):
        return pl.BlockSpec((tb, width), lambda i: (i, 0))

    def const_spec(arr):
        return pl.BlockSpec(arr.shape, lambda i: (0, 0))

    flops = 2 * b_pad * (
        input_dim * dh + dh * dh2 + dh2 * (dmv + dh2) + dh2 * dh + dh * di
    )
    bytes_accessed = (
        b_pad * input_dim * 4
        + sum(int(a.size) * a.dtype.itemsize for a in packed_params)
        + b_pad * di * 4
        + b_pad * dmv * 4
    )

    recon_p, mulv_p = pl.pallas_call(
        functools.partial(vae_kernel, mv_width=dmv),
        out_shape=(
            jax.ShapeDtypeStruct((b_pad, di), jnp.float32),    # recon (padded lanes)
            jax.ShapeDtypeStruct((b_pad, dmv), jnp.float32),   # mu || logvar (tight slab)
        ),
        grid=grid,
        # x streamed unpadded (block last dim == full array dim), cast in-kernel.
        in_specs=[pl.BlockSpec((tb, input_dim), lambda i: (i, 0))]
        + [const_spec(a) for a in packed_params],
        out_specs=(row_spec(di), row_spec(dmv)),
        compiler_params=pltpu.CompilerParams(
            dimension_semantics=("parallel",),
        ),
        cost_estimate=pl.CostEstimate(
            flops=flops, transcendentals=0, bytes_accessed=bytes_accessed
        ),
    )(x, *packed_params)

    recon = recon_p[:B, :input_dim]
    mu = mulv_p[:B, :latent_dim]
    logvar = mulv_p[:B, latent_dim:2 * latent_dim]
    return recon, mu, logvar


# ----------------------------------------------------------------------------
# Pure-JAX f32 reference (PyTorch eval-mode forward) for a tolerance check.
# ----------------------------------------------------------------------------
def vae_reference(x, p):
    def lrelu(v):
        return jnp.where(v >= 0, v, 0.2 * v)

    def bn(v, s, t):
        return v * s + t

    h = lrelu(bn(x @ p["w1"] + p["b1"], p["s1"], p["t1"]))
    h = lrelu(bn(h @ p["w2"] + p["b2"], p["s2"], p["t2"]))
    mu = h @ p["wmu"] + p["bmu"]
    logvar = h @ p["wvar"] + p["bvar"]
    z = mu                                           # eval-mode reparameterize
    d = lrelu(bn(z @ p["wd1"] + p["bd1"], p["s3"], p["t3"]))
    d = lrelu(bn(d @ p["wd2"] + p["bd2"], p["s4"], p["t4"]))
    recon = d @ p["wd3"] + p["bd3"]
    return recon, mu, logvar


def _assert_close(a, b, name):
    err = float(jnp.max(jnp.abs(a - b)))
    scale = float(jnp.max(jnp.abs(b))) + 1e-6
    # bf16 weights/activations vs f32 reference -> generous tolerance.
    assert err <= 0.05 * scale + 0.05, f"{name} mismatch: max_err={err}, scale={scale}"


if __name__ == "__main__":
    # Small shapes consistent with SimpleVAE(input_dim=32, hidden_dim=64, latent_dim=32).
    batch = 8
    input_dim = 32
    hidden_dim = 64
    latent_dim = 32

    key = jax.random.PRNGKey(0)
    k_x, k_p = jax.random.split(key)
    x = jax.random.normal(k_x, (batch, input_dim), dtype=jnp.float32)

    params = make_vae_params(k_p, input_dim, hidden_dim, latent_dim)
    packed = prepare_params(params, input_dim, hidden_dim, latent_dim)

    recon, mu, logvar = simple_vae_forward(x, packed, latent_dim)
    jax.block_until_ready((recon, mu, logvar))

    assert recon.shape == (batch, input_dim)
    assert mu.shape == (batch, latent_dim)
    assert logvar.shape == (batch, latent_dim)
    assert bool(jnp.all(jnp.isfinite(recon)))
    assert bool(jnp.all(jnp.isfinite(mu)))
    assert bool(jnp.all(jnp.isfinite(logvar)))

    recon_ref, mu_ref, logvar_ref = vae_reference(x, params)
    _assert_close(recon, recon_ref, "recon")
    _assert_close(mu, mu_ref, "mu")
    _assert_close(logvar, logvar_ref, "logvar")

    print("KERNEL_OK")
</pallas_src>

<mosaic_0001>
module attributes {stable_mosaic.version = 11 : i64} {
  func.func @vae_kernel(%arg0: i32, %arg1: memref<8x32xf32, #tpu.memory_space<vmem>>, %arg2: memref<32x128xbf16, #tpu.memory_space<vmem>>, %arg3: memref<1x128xf32, #tpu.memory_space<vmem>>, %arg4: memref<128x128xbf16, #tpu.memory_space<vmem>>, %arg5: memref<1x128xf32, #tpu.memory_space<vmem>>, %arg6: memref<128x256xbf16, #tpu.memory_space<vmem>>, %arg7: memref<1x256xf32, #tpu.memory_space<vmem>>, %arg8: memref<128x128xbf16, #tpu.memory_space<vmem>>, %arg9: memref<1x128xf32, #tpu.memory_space<vmem>>, %arg10: memref<128x128xbf16, #tpu.memory_space<vmem>>, %arg11: memref<1x128xf32, #tpu.memory_space<vmem>>, %arg12: memref<8x128xf32, #tpu.memory_space<vmem>>, %arg13: memref<8x128xf32, #tpu.memory_space<vmem>>) attributes {dimension_semantics = [#tpu.dimension_semantics<parallel>], iteration_bounds = array<i64: 1>, scalar_prefetch = 0 : i64, scratch_operands = 0 : i64, tpu.core_type = #tpu.core_type<tc>, window_params = [{transform_indices = @transform_0, window_bounds = array<i64: 8, 32>}, {pipeline_mode = #tpu.pipeline_mode<synchronous>, transform_indices = @transform_1, window_bounds = array<i64: 32, 128>}, {pipeline_mode = #tpu.pipeline_mode<synchronous>, transform_indices = @transform_2, window_bounds = array<i64: 1, 128>}, {pipeline_mode = #tpu.pipeline_mode<synchronous>, transform_indices = @transform_3, window_bounds = array<i64: 128, 128>}, {pipeline_mode = #tpu.pipeline_mode<synchronous>, transform_indices = @transform_4, window_bounds = array<i64: 1, 128>}, {pipeline_mode = #tpu.pipeline_mode<synchronous>, transform_indices = @transform_5, window_bounds = array<i64: 128, 256>}, {pipeline_mode = #tpu.pipeline_mode<synchronous>, transform_indices = @transform_6, window_bounds = array<i64: 1, 256>}, {pipeline_mode = #tpu.pipeline_mode<synchronous>, transform_indices = @transform_7, window_bounds = array<i64: 128, 128>}, {pipeline_mode = #tpu.pipeline_mode<synchronous>, transform_indices = @transform_8, window_bounds = array<i64: 1, 128>}, {pipeline_mode = #tpu.pipeline_mode<synchronous>, transform_indices = @transform_9, window_bounds = array<i64: 128, 128>}, {pipeline_mode = #tpu.pipeline_mode<synchronous>, transform_indices = @transform_10, window_bounds = array<i64: 1, 128>}, {transform_indices = @transform_11, window_bounds = array<i64: 8, 128>}, {transform_indices = @transform_12, window_bounds = array<i64: 8, 128>}]} {
    %c0 = arith.constant 0 : index
    %c0_0 = arith.constant 0 : index
    %0 = vector.load %arg1[%c0, %c0_0] : memref<8x32xf32, #tpu.memory_space<vmem>>, vector<8x32xf32>
    %1 = arith.truncf %0 : vector<8x32xf32> to vector<8x32xbf16>
    %c0_1 = arith.constant 0 : index
    %c0_2 = arith.constant 0 : index
    %2 = vector.load %arg2[%c0_1, %c0_2] : memref<32x128xbf16, #tpu.memory_space<vmem>>, vector<32x128xbf16>
    %cst = arith.constant dense<0.000000e+00> : vector<8x128xf32>
    %3 = tpu.matmul %1, %2, %cst {dimension_numbers = #tpu.dot_dimension_numbers<[1], [0], [0], [1], [0, 0, 1, 1], [], []>} : vector<8x32xbf16>, vector<32x128xbf16>, vector<8x128xf32> -> vector<8x128xf32>
    %c0_3 = arith.constant 0 : index
    %c0_4 = arith.constant 0 : index
    %4 = vector.load %arg3[%c0_3, %c0_4] : memref<1x128xf32, #tpu.memory_space<vmem>>, vector<1x128xf32>
    %5 = vector.broadcast %4 : vector<1x128xf32> to vector<8x128xf32>
    %6 = arith.addf %3, %5 : vector<8x128xf32>
    %cst_5 = arith.constant 2.000000e-01 : f32
    %7 = vector.broadcast %cst_5 : f32 to vector<8x128xf32>
    %8 = arith.mulf %7, %6 : vector<8x128xf32>
    %9 = arith.maximumf %6, %8 : vector<8x128xf32>
    %10 = arith.truncf %9 : vector<8x128xf32> to vector<8x128xbf16>
    %c0_6 = arith.constant 0 : index
    %c0_7 = arith.constant 0 : index
    %11 = vector.load %arg4[%c0_6, %c0_7] : memref<128x128xbf16, #tpu.memory_space<vmem>>, vector<128x128xbf16>
    %cst_8 = arith.constant dense<0.000000e+00> : vector<8x128xf32>
    %12 = tpu.matmul %10, %11, %cst_8 {dimension_numbers = #tpu.dot_dimension_numbers<[1], [0], [0], [1], [0, 0, 1, 1], [], []>} : vector<8x128xbf16>, vector<128x128xbf16>, vector<8x128xf32> -> vector<8x128xf32>
    %c0_9 = arith.constant 0 : index
    %c0_10 = arith.constant 0 : index
    %13 = vector.load %arg5[%c0_9, %c0_10] : memref<1x128xf32, #tpu.memory_space<vmem>>, vector<1x128xf32>
    %14 = vector.broadcast %13 : vector<1x128xf32> to vector<8x128xf32>
    %15 = arith.addf %12, %14 : vector<8x128xf32>
    %cst_11 = arith.constant 2.000000e-01 : f32
    %16 = vector.broadcast %cst_11 : f32 to vector<8x128xf32>
    %17 = arith.mulf %16, %15 : vector<8x128xf32>
    %18 = arith.maximumf %15, %17 : vector<8x128xf32>
    %19 = arith.truncf %18 : vector<8x128xf32> to vector<8x128xbf16>
    %c0_12 = arith.constant 0 : index
    %c0_13 = arith.constant 0 : index
    %20 = vector.load %arg6[%c0_12, %c0_13] : memref<128x256xbf16, #tpu.memory_space<vmem>>, vector<128x256xbf16>
    %cst_14 = arith.constant dense<0.000000e+00> : vector<8x256xf32>
    %21 = tpu.matmul %19, %20, %cst_14 {dimension_numbers = #tpu.dot_dimension_numbers<[1], [0], [0], [1], [0, 0, 1, 1], [], []>} : vector<8x128xbf16>, vector<128x256xbf16>, vector<8x256xf32> -> vector<8x256xf32>
    %c0_15 = arith.constant 0 : index
    %c0_16 = arith.constant 0 : index
    %22 = vector.load %arg7[%c0_15, %c0_16] : memref<1x256xf32, #tpu.memory_space<vmem>>, vector<1x256xf32>
    %23 = vector.broadcast %22 : vector<1x256xf32> to vector<8x256xf32>
    %24 = arith.addf %21, %23 : vector<8x256xf32>
    %25 = vector.extract_strided_slice %24 {offsets = [0, 0], sizes = [8, 128], strides = [1, 1]} : vector<8x256xf32> to vector<8x128xf32>
    %c0_17 = arith.constant 0 : index
    %c0_18 = arith.constant 0 : index
    %26 = vector.load %arg13[%c0_17, %c0_18] : memref<8x128xf32, #tpu.memory_space<vmem>>, vector<8x128xf32>
    tpu.vector_store %arg13[%c0_17, %c0_18], %25 {strides = array<i32>} : memref<8x128xf32, #tpu.memory_space<vmem>>, vector<8x128xf32>,
    %27 = vector.extract_strided_slice %24 {offsets = [0, 128], sizes = [8, 128], strides = [1, 1]} : vector<8x256xf32> to vector<8x128xf32>
    %cst_19 = arith.constant 2.000000e-01 : f32
    %28 = vector.broadcast %cst_19 : f32 to vector<8x128xf32>
    %29 = arith.mulf %28, %27 : vector<8x128xf32>
    %30 = arith.maximumf %27, %29 : vector<8x128xf32>
    %31 = arith.truncf %30 : vector<8x128xf32> to vector<8x128xbf16>
    %c0_20 = arith.constant 0 : index
    %c0_21 = arith.constant 0 : index
    %32 = vector.load %arg8[%c0_20, %c0_21] : memref<128x128xbf16, #tpu.memory_space<vmem>>, vector<128x128xbf16>
    %cst_22 = arith.constant dense<0.000000e+00> : vector<8x128xf32>
    %33 = tpu.matmul %31, %32, %cst_22 {dimension_numbers = #tpu.dot_dimension_numbers<[1], [0], [0], [1], [0, 0, 1, 1], [], []>} : vector<8x128xbf16>, vector<128x128xbf16>, vector<8x128xf32> -> vector<8x128xf32>
    %c0_23 = arith.constant 0 : index
    %c0_24 = arith.constant 0 : index
    %34 = vector.load %arg9[%c0_23, %c0_24] : memref<1x128xf32, #tpu.memory_space<vmem>>, vector<1x128xf32>
    %35 = vector.broadcast %34 : vector<1x128xf32> to vector<8x128xf32>
    %36 = arith.addf %33, %35 : vector<8x128xf32>
    %cst_25 = arith.constant 2.000000e-01 : f32
    %37 = vector.broadcast %cst_25 : f32 to vector<8x128xf32>
    %38 = arith.mulf %37, %36 : vector<8x128xf32>
    %39 = arith.maximumf %36, %38 : vector<8x128xf32>
    %40 = arith.truncf %39 : vector<8x128xf32> to vector<8x128xbf16>
    %c0_26 = arith.constant 0 : index
    %c0_27 = arith.constant 0 : index
    %41 = vector.load %arg10[%c0_26, %c0_27] : memref<128x128xbf16, #tpu.memory_space<vmem>>, vector<128x128xbf16>
    %cst_28 = arith.constant dense<0.000000e+00> : vector<8x128xf32>
    %42 = tpu.matmul %40, %41, %cst_28 {dimension_numbers = #tpu.dot_dimension_numbers<[1], [0], [0], [1], [0, 0, 1, 1], [], []>} : vector<8x128xbf16>, vector<128x128xbf16>, vector<8x128xf32> -> vector<8x128xf32>
    %c0_29 = arith.constant 0 : index
    %c0_30 = arith.constant 0 : index
    %43 = vector.load %arg11[%c0_29, %c0_30] : memref<1x128xf32, #tpu.memory_space<vmem>>, vector<1x128xf32>
    %44 = vector.broadcast %43 : vector<1x128xf32> to vector<8x128xf32>
    %45 = arith.addf %42, %44 : vector<8x128xf32>
    %c0_31 = arith.constant 0 : index
    %c0_32 = arith.constant 0 : index
    %46 = vector.load %arg12[%c0_31, %c0_32] : memref<8x128xf32, #tpu.memory_space<vmem>>, vector<8x128xf32>
    tpu.vector_store %arg12[%c0_31, %c0_32], %45 {strides = array<i32>} : memref<8x128xf32, #tpu.memory_space<vmem>>, vector<8x128xf32>,
    return
  }
  func.func @transform_0(%arg0: i32) -> (i32, i32) {
    %c0_i32 = arith.constant 0 : i32
    %c0_i32_0 = arith.constant 0 : i32
    return %arg0, %c0_i32 : i32, i32
  }
  func.func @transform_1(%arg0: i32) -> (i32, i32) {
    %c0_i32 = arith.constant 0 : i32
    %c0_i32_0 = arith.constant 0 : i32
    %c0_i32_1 = arith.constant 0 : i32
    return %c0_i32, %c0_i32_0 : i32, i32
  }
  func.func @transform_2(%arg0: i32) -> (i32, i32) {
    %c0_i32 = arith.constant 0 : i32
    %c0_i32_0 = arith.constant 0 : i32
    %c0_i32_1 = arith.constant 0 : i32
    return %c0_i32, %c0_i32_0 : i32, i32
  }
  func.func @transform_3(%arg0: i32) -> (i32, i32) {
    %c0_i32 = arith.constant 0 : i32
    %c0_i32_0 = arith.constant 0 : i32
    %c0_i32_1 = arith.constant 0 : i32
    return %c0_i32, %c0_i32_0 : i32, i32
  }
  func.func @transform_4(%arg0: i32) -> (i32, i32) {
    %c0_i32 = arith.constant 0 : i32
    %c0_i32_0 = arith.constant 0 : i32
    %c0_i32_1 = arith.constant 0 : i32
    return %c0_i32, %c0_i32_0 : i32, i32
  }
  func.func @transform_5(%arg0: i32) -> (i32, i32) {
    %c0_i32 = arith.constant 0 : i32
    %c0_i32_0 = arith.constant 0 : i32
    %c0_i32_1 = arith.constant 0 : i32
    return %c0_i32, %c0_i32_0 : i32, i32
  }
  func.func @transform_6(%arg0: i32) -> (i32, i32) {
    %c0_i32 = arith.constant 0 : i32
    %c0_i32_0 = arith.constant 0 : i32
    %c0_i32_1 = arith.constant 0 : i32
    return %c0_i32, %c0_i32_0 : i32, i32
  }
  func.func @transform_7(%arg0: i32) -> (i32, i32) {
    %c0_i32 = arith.constant 0 : i32
    %c0_i32_0 = arith.constant 0 : i32
    %c0_i32_1 = arith.constant 0 : i32
    return %c0_i32, %c0_i32_0 : i32, i32
  }
  func.func @transform_8(%arg0: i32) -> (i32, i32) {
    %c0_i32 = arith.constant 0 : i32
    %c0_i32_0 = arith.constant 0 : i32
    %c0_i32_1 = arith.constant 0 : i32
    return %c0_i32, %c0_i32_0 : i32, i32
  }
  func.func @transform_9(%arg0: i32) -> (i32, i32) {
    %c0_i32 = arith.constant 0 : i32
    %c0_i32_0 = arith.constant 0 : i32
    %c0_i32_1 = arith.constant 0 : i32
    return %c0_i32, %c0_i32_0 : i32, i32
  }
  func.func @transform_10(%arg0: i32) -> (i32, i32) {
    %c0_i32 = arith.constant 0 : i32
    %c0_i32_0 = arith.constant 0 : i32
    %c0_i32_1 = arith.constant 0 : i32
    return %c0_i32, %c0_i32_0 : i32, i32
  }
  func.func @transform_11(%arg0: i32) -> (i32, i32) {
    %c0_i32 = arith.constant 0 : i32
    %c0_i32_0 = arith.constant 0 : i32
    return %arg0, %c0_i32 : i32, i32
  }
  func.func @transform_12(%arg0: i32) -> (i32, i32) {
    %c0_i32 = arith.constant 0 : i32
    %c0_i32_0 = arith.constant 0 : i32
    return %arg0, %c0_i32 : i32, i32
  }
}

</mosaic_0001>

<bundles_post_ra>
// kernel: simple_vae_forward.1
= control target key start
LH: loop header
LB: loop body
LE: loop exit
PB: predicated region body
PF: predicated region fallthrough
CT: control target
= control target key end

     0   :  { %18 = vsyncpa [#allocation3], 0  ;;  %s1152_s0 = inlined_call_operand.hbm [shape: f32[8,32], index: 0, kind: input, shape index: {}]   ;;  %s1153_s1 = inlined_call_operand.hbm [shape: bf16[32,128], index: 1, kind: input, shape index: {}]   ;;  %s1154_s2 = inlined_call_operand.vmem [shape: f32[1,128], index: 2, kind: input, shape index: {}]   ;;  %s1155_s3 = inlined_call_operand.hbm [shape: bf16[128,128], index: 3, kind: input, shape index: {}]   ;;  %s1156_s4 = inlined_call_operand.hbm [shape: f32[1,128], index: 4, kind: input, shape index: {}]   ;;  %s1157_s5 = inlined_call_operand.hbm [shape: bf16[128,256], index: 5, kind: input, shape index: {}]   ;;  %s1158_s6 = inlined_call_operand.vmem [shape: f32[1,256], index: 6, kind: input, shape index: {}]   ;;  %s1159_s7 = inlined_call_operand.hbm [shape: bf16[128,128], index: 7, kind: input, shape index: {}]   ;;  %s1160_s8 = inlined_call_operand.vmem [shape: f32[1,128], index: 8, kind: input, shape index: {}]   ;;  %s1161_s9 = inlined_call_operand.hbm [shape: bf16[128,128], index: 9, kind: input, shape index: {}]   ;;  %s1162_s10 = inlined_call_operand.vmem [shape: f32[1,128], index: 10, kind: input, shape index: {}]   ;;  %s1163_s11 = inlined_call_operand.hbm [shape: f32[8,128], index: 11, kind: output, shape index: {0}]   ;;  %s1164_s12 = inlined_call_operand.vmem [shape: f32[8,128], index: 12, kind: output, shape index: {1}]  }
   0x1   :  { %19 = vsyncpa [#allocation6], 0 }
   0x2   :  { %20 = vsyncpa [#allocation9], 0 }
   0x3   :  { %21 = vsyncpa [#allocation12], 0  ;;  %s38_s23 = sshll.u32 %s1153_s1, 4  ;;  %s39_s23 = int_to_ptr.hbm [resolvable:$true] %s38_s23 }
   0x4   :  { %22 = vsyncpa [#allocation4], 0  ;;  %s1024_s24 = smov [#allocation5]   ;;  %s67_s28 = sshll.u32 %s1156_s4, 4  ;;  %s68_s28 = int_to_ptr.hbm [resolvable:$true] %s67_s28 }
   0x5   :  { %s40_s25 = sshll.u32 %s1024_s24, 4  ;;  %s1025_s29 = smov 64   ;;  %s41_s25 = int_to_ptr.vmem [resolvable:$true] %s40_s25 }
   0x6   :  { %s1026_s30 = smov 4   ;;  %s1027_s13 = smov [#allocation8]  }
   0x7   :  { %46 = dma.hbm_to_vmem [thread:$0]  %s39_s23, 256, %s41_s25, [#allocation6], %s1025_s29, %s1025_s29, %s1026_s30  }
   0x8   :  { %s69_s14 = sshll.u32 %s1027_s13, 4  ;;  %s92_s16 = sshll.u32 %s1159_s7, 4  ;;  %s70_s14 = int_to_ptr.vmem [resolvable:$true] %s69_s14  ;;  %s93_s16 = int_to_ptr.hbm [resolvable:$true] %s92_s16 }
   0x9   :  { %72 = dma.hbm_to_vmem [thread:$0]  %s68_s28, 16, %s70_s14, [#allocation9]  }
   0xa   :  { %s28_s4 = sshll.u32 %s1152_s0, 4  ;;  %s1028_s19 = smov [#allocation11]   ;;  %s29_s4 = int_to_ptr.hbm [resolvable:$true] %s28_s4 }
   0xb   :  { %s94_s20 = sshll.u32 %s1028_s19, 4  ;;  %s1029_s21 = smov [#allocation2]   ;;  %s95_s20 = int_to_ptr.vmem [resolvable:$true] %s94_s20 }
   0xc   :  { %100 = dma.hbm_to_vmem [thread:$0]  %s93_s16, 1024, %s95_s20, [#allocation12], %s1025_s29, %s1025_s29, %s1026_s30  }
   0xd   :  { %s30_s22 = sshll.u32 %s1029_s21, 4  ;;  %s53_s7 = sshll.u32 %s1155_s3, 4  ;;  %s31_s22 = int_to_ptr.vmem [resolvable:$true] %s30_s22  ;;  %s54_s7 = int_to_ptr.hbm [resolvable:$true] %s53_s7 }
   0xe   :  { %33 = dma.hbm_to_vmem [thread:$0]  %s29_s4, 128, %s31_s22, [#allocation3]  }
   0xf   :  { %s77_s0 = sshll.u32 %s1157_s5, 4  ;;  %s1030_s27 = smov [#allocation7]   ;;  %s78_s0 = int_to_ptr.hbm [resolvable:$true] %s77_s0 }
  0x10   :  { %s55_s28 = sshll.u32 %s1030_s27, 4  ;;  %s1031_s13 = smov [#allocation10]   ;;  %s56_s28 = int_to_ptr.vmem [resolvable:$true] %s55_s28 }
  0x11   :  { %61 = dma.hbm_to_vmem [thread:$0]  %s54_s7, 1024, %s56_s28, [#allocation6], %s1025_s29, %s1025_s29, %s1026_s30  }
  0x12   :  { %s79_s14 = sshll.u32 %s1031_s13, 4  ;;  %s1032_s15 = smov 128   ;;  %s80_s14 = int_to_ptr.vmem [resolvable:$true] %s79_s14 }
  0x13   :  { %s1033_s3 = smov 8   ;;  %s107_s17 = sshll.u32 %s1161_s9, 4  ;;  %s108_s17 = int_to_ptr.hbm [resolvable:$true] %s107_s17 }
  0x14   :  { %85 = dma.hbm_to_vmem [thread:$0]  %s78_s0, 2048, %s80_s14, [#allocation9], %s1032_s15, %s1032_s15, %s1033_s3  }
  0x15   :  { %s1034_s5 = smov [#allocation13]  }
  0x16   :  { %s109_s18 = sshll.u32 %s1034_s5, 4  ;;  %s110_s18 = int_to_ptr.vmem [resolvable:$true] %s109_s18 }
  0x17   :  { %115 = dma.hbm_to_vmem [thread:$0]  %s108_s17, 1024, %s110_s18, [#allocation12], %s1025_s29, %s1025_s29, %s1026_s30  }
  0x18   :  { %1014 = dma.done.wait [#allocation3], 128  }
  0x19   :  { %1015 = vsyncadd [#allocation3], 4294967168 }
  0x1a   :  { %1016 = dma.done.wait [#allocation6], 1280  }
  0x1b   :  { %1017 = vsyncadd [#allocation6], 4294966016 }
  0x1c   :  { %1018 = dma.done.wait [#allocation9], 2064  }
  0x1d   :  { %1019 = vsyncadd [#allocation9], 4294965232 }
  0x1e   :  { %1020 = dma.done.wait [#allocation12], 2048  }
  0x1f   :  { %1021 = vsyncadd [#allocation12], 4294965248  ;;  %v765_v0 = vld [vmem:[#allocation5 + $0x8] sm:$0xff]  ;;  %v764_v2 = vld [vmem:[#allocation5] sm:$0xff]  ;;  %vm169_vm0 = vcmask 261120   ;;  %s1035_s22 = smov [#allocation14]  }
  0x20   :  { %v773_v1 = vld [vmem:[#allocation7 + $0x38] sm:$0xff]  ;;  %179 = vmatpush.bf16.msra.mxu0 %v765_v0  ;;  %v147_v3 = vld [vmem:[#allocation2] sm:$0xff]  ;;  %v772_v4 = vld [vmem:[#allocation7 + $0x30] sm:$0xff]  ;;  %s576_s23 = sshll.u32 %s1035_s22, 4  ;;  %s578_s25 = sshll.u32 %s1163_s11, 4  ;;  %s577_s23 = int_to_ptr.vmem [resolvable:$true] %s576_s23  ;;  %s579_s25 = int_to_ptr.hbm [resolvable:$true] %s578_s25 }
  0x21   :  { %257 = vmatpush.bf16.msra.mxu1 %v773_v1  ;;  %v148_v5 = vpack.c.bf16 %v147_v3, %v147_v3  ;;  %v771_v6 = vld [vmem:[#allocation7 + $0x28] sm:$0xff]  ;;  %v770_v7 = vld [vmem:[#allocation7 + $0x20] sm:$0xff]  ;;  %v769_v8 = vld [vmem:[#allocation7 + $0x18] sm:$0xff] }
  0x22   :  { %v768_v9 = vld [vmem:[#allocation7 + $0x10] sm:$0xff]  ;;  %v767_v10 = vld [vmem:[#allocation7 + $0x8] sm:$0xff]  ;;  %v766_v11 = vld [vmem:[#allocation7] sm:$0xff] }
  0x23   :  { %v694_v12 = vld [vmem:[#allocation10 + $0x70] sm:$0xf]  ;;  %v789_v13 = vld [vmem:[#allocation10 + $0x74] sm:$0xf0]  ;;  %v788_v14 = vld [vmem:[#allocation10 + $0x74] sm:$0xf] }
  0x24   :  { %180 = vmatpush.bf16.msra.mxu0 %v764_v2  ;;  %v695_v15 = vor.u32 %v789_v13, %v694_v12  ;;  %v696_v16 = vld [vmem:[#allocation10 + $0x78] sm:$0xf0]  ;;  %v686_v17 = vld [vmem:[#allocation10 + $0x60] sm:$0xf]  ;;  %v787_v18 = vld [vmem:[#allocation10 + $0x64] sm:$0xf0] }
  0x25   :  { %258 = vmatpush.bf16.msra.mxu1 %v772_v4  ;;  %v699_v19 = vor.u32 %v788_v14, %v696_v16  ;;  %v786_v20 = vld [vmem:[#allocation10 + $0x64] sm:$0xf]  ;;  %v688_v21 = vld [vmem:[#allocation10 + $0x68] sm:$0xf0]  ;;  %v687_v22 = vor.u32 %v787_v18, %v686_v17  ;;  %v678_v24 = vld [vmem:[#allocation10 + $0x50] sm:$0xf] }
  0x26   :  { %375 = vmatpush.bf16.msra.mxu2 %v695_v15  ;;  %v691_v23 = vor.u32 %v786_v20, %v688_v21  ;;  %v785_v25 = vld [vmem:[#allocation10 + $0x54] sm:$0xf0]  ;;  %v784_v26 = vld [vmem:[#allocation10 + $0x54] sm:$0xf]  ;;  %v680_v27 = vld [vmem:[#allocation10 + $0x58] sm:$0xf0] }
  0x27   :  { %603 = vmatmul.msk.bf16.vlgmr.msra.gmra.mxu0 %vm169_vm0, %v148_v5  ;;  %388 = vmatpush.bf16.msra.mxu3 %v699_v19  ;;  %v679_v28 = vor.u32 %v785_v25, %v678_v24  ;;  %v683_v29 = vor.u32 %v784_v26, %v680_v27  ;;  %v670_v30 = vld [vmem:[#allocation10 + $0x40] sm:$0xf]  ;;  %v783_v31 = vld [vmem:[#allocation10 + $0x44] sm:$0xf0]  ;;  %v782_v32 = vld [vmem:[#allocation10 + $0x44] sm:$0xf] }
  0x28   :  { %v672_v33 = vld [vmem:[#allocation10 + $0x48] sm:$0xf0]  ;;  %v671_v34 = vor.u32 %v783_v31, %v670_v30  ;;  %v662_v36 = vld [vmem:[#allocation10 + $0x30] sm:$0xf]  ;;  %v781_v37 = vld [vmem:[#allocation10 + $0x34] sm:$0xf0] }
  0x29   :  { %259 = vmatpush.bf16.msra.mxu1 %v771_v6  ;;  %v675_v35 = vor.u32 %v782_v32, %v672_v33  ;;  %v780_v38 = vld [vmem:[#allocation10 + $0x34] sm:$0xf]  ;;  %v664_v39 = vld [vmem:[#allocation10 + $0x38] sm:$0xf0]  ;;  %v663_v40 = vor.u32 %v781_v37, %v662_v36  ;;  %v654_v42 = vld [vmem:[#allocation10 + $0x20] sm:$0xf] }
  0x2a   :  { %376 = vmatpush.bf16.msra.mxu2 %v687_v22  ;;  %v667_v41 = vor.u32 %v780_v38, %v664_v39  ;;  %v779_v43 = vld [vmem:[#allocation10 + $0x24] sm:$0xf0]  ;;  %v778_v44 = vld [vmem:[#allocation10 + $0x24] sm:$0xf]  ;;  %v656_v45 = vld [vmem:[#allocation10 + $0x28] sm:$0xf0] }
  0x2b   :  { %389 = vmatpush.bf16.msra.mxu3 %v691_v23  ;;  %v655_v46 = vor.u32 %v779_v43, %v654_v42  ;;  %v818_v47 = vld [vmem:[%s1154_s2] ss:$0 sm:$0xff]  ;;  %v659_v48 = vor.u32 %v778_v44, %v656_v45  ;;  %v646_v55 = vld [vmem:[#allocation10 + $0x10] sm:$0xf]  ;;  %v777_v56 = vld [vmem:[#allocation10 + $0x14] sm:$0xf0] }
  0x2c   :  { %v776_v57 = vld [vmem:[#allocation10 + $0x14] sm:$0xf]  ;;  %v647_v58 = vor.u32 %v777_v56, %v646_v55  ;;  %v648_v59 = vld [vmem:[#allocation10 + $0x18] sm:$0xf0]  ;;  %v638_v61 = vld [vmem:[#allocation10] sm:$0xf] }
  0x2d   :  { %260 = vmatpush.bf16.msra.mxu1 %v770_v7  ;;  %v651_v60 = vor.u32 %v776_v57, %v648_v59  ;;  %v775_v62 = vld [vmem:[#allocation10 + $0x4] sm:$0xf0]  ;;  %v774_v63 = vld [vmem:[#allocation10 + $0x4] sm:$0xf]  ;;  %v640_v1 = vld [vmem:[#allocation10 + $0x8] sm:$0xf0] }
  0x2e   :  { %377 = vmatpush.bf16.msra.mxu2 %v679_v28  ;;  %v639_v0 = vor.u32 %v775_v62, %v638_v61  ;;  %v643_v2 = vor.u32 %v774_v63, %v640_v1  ;;  %v797_v3 = vld [vmem:[#allocation11 + $0x38] sm:$0xff]  ;;  %v796_v4 = vld [vmem:[#allocation11 + $0x30] sm:$0xff]  ;;  %v795_v5 = vld [vmem:[#allocation11 + $0x28] sm:$0xff] }
  0x2f   :  { %390 = vmatpush.bf16.msra.mxu3 %v683_v29  ;;  %473 = vmatpush.bf16.msrb.mxu0 %v797_v3  ;;  %v794_v6 = vld [vmem:[#allocation11 + $0x20] sm:$0xff]  ;;  %v793_v7 = vld [vmem:[#allocation11 + $0x18] sm:$0xff]  ;;  %v791_v16 = vld [vmem:[#allocation11 + $0x8] sm:$0xff] }
  0x30   :  { %v790_v17 = vld [vmem:[#allocation11] sm:$0xff]  ;;  %v805_v18 = vld [vmem:[#allocation13 + $0x38] sm:$0xff]  ;;  %v804_v19 = vld [vmem:[#allocation13 + $0x30] sm:$0xff] }
  0x31   :  { %261 = vmatpush.bf16.msra.mxu1 %v769_v8  ;;  %v792_v8 = vld [vmem:[#allocation11 + $0x10] sm:$0xff]  ;;  %v803_v20 = vld [vmem:[#allocation13 + $0x28] sm:$0xff]  ;;  %v802_v21 = vld [vmem:[#allocation13 + $0x20] sm:$0xff] }
  0x32   :  { %378 = vmatpush.bf16.msra.mxu2 %v671_v34  ;;  %v801_v22 = vld [vmem:[#allocation13 + $0x18] sm:$0xff]  ;;  %v289_v23 = vld [vmem:[%s1158_s6] sm:$0x3]  ;;  %v800_v24 = vld [vmem:[#allocation13 + $0x10] sm:$0xff] }
  0x33   :  { %391 = vmatpush.bf16.msra.mxu3 %v675_v35  ;;  %474 = vmatpush.bf16.msrb.mxu0 %v796_v4  ;;  %v291_v25 = vperm.slane %v289_v23, 0  ;;  %v292_v26 = vperm.slane %v289_v23, 1  ;;  %v799_v36 = vld [vmem:[#allocation13 + $0x8] sm:$0xff]  ;;  %v798_v37 = vld [vmem:[#allocation13] sm:$0xff] }
  0x34   :  { %v820_v38 = vld [vmem:[%s1160_s8] ss:$0 sm:$0xff] }
  0x35   :  { %262 = vmatpush.bf16.msra.mxu1 %v768_v9  ;;  %v819_v9 = vld [vmem:[#allocation8] ss:$0 sm:$0xff]  ;;  %v821_v45 = vld [vmem:[%s1162_s10] ss:$0 sm:$0xff] }
  0x36   :  { %379 = vmatpush.bf16.msra.mxu2 %v663_v40 }
  0x37   :  { %392 = vmatpush.bf16.msra.mxu3 %v667_v41  ;;  %475 = vmatpush.bf16.msrb.mxu0 %v795_v5 }
  0x39   :  { %263 = vmatpush.bf16.msra.mxu1 %v767_v10 }
  0x3a   :  { %380 = vmatpush.bf16.msra.mxu2 %v655_v46 }
  0x3b   :  { %393 = vmatpush.bf16.msra.mxu3 %v659_v48  ;;  %476 = vmatpush.bf16.msrb.mxu0 %v794_v6 }
  0x3d   :  { %264 = vmatpush.bf16.msra.mxu1 %v766_v11 }
  0x3e   :  { %381 = vmatpush.bf16.msra.mxu2 %v647_v58 }
  0x3f   :  { %394 = vmatpush.bf16.msra.mxu3 %v651_v60  ;;  %477 = vmatpush.bf16.msrb.mxu0 %v793_v7 }
  0x41   :  { %557 = vmatpush.bf16.msrb.mxu1 %v805_v18 }
  0x42   :  { %382 = vmatpush.bf16.msra.mxu2 %v639_v0 }
  0x43   :  { %395 = vmatpush.bf16.msra.mxu3 %v643_v2  ;;  %478 = vmatpush.bf16.msrb.mxu0 %v792_v8 }
  0x45   :  { %558 = vmatpush.bf16.msrb.mxu1 %v804_v19 }
  0x47   :  { %479 = vmatpush.bf16.msrb.mxu0 %v791_v16 }
  0x49   :  { %559 = vmatpush.bf16.msrb.mxu1 %v803_v20 }
  0x4b   :  { %480 = vmatpush.bf16.msrb.mxu0 %v790_v17 }
  0x4d   :  { %560 = vmatpush.bf16.msrb.mxu1 %v802_v21 }
  0x51   :  { %561 = vmatpush.bf16.msrb.mxu1 %v801_v22 }
  0x55   :  { %562 = vmatpush.bf16.msrb.mxu1 %v800_v24 }
  0x59   :  { %563 = vmatpush.bf16.msrb.mxu1 %v799_v36 }
  0x5d   :  { %564 = vmatpush.bf16.msrb.mxu1 %v798_v37 }
  0xa4   :  { %v182_v49 = vpop.f32.mrf.mxu0 }
  0xa5   :  { %v183_v50 = vadd.f32 %v818_v47, %v182_v49 }
  0xa7   :  { %v186_v51 = vmul.f32 0.2, %v183_v50 }
  0xa9   :  { %v187_v52 = vmax.f32 %v183_v50, %v186_v51 }
  0xab   :  { %v188_v53 = vpack.c.bf16 %v187_v52, %v187_v52 }
  0xac   :  { %v184_v54 = vpop.f32.mrf.mxu0 }
  0xad   :  { %265 = vmatmul.bf16.vlgmr.msra.gmra.mxu1 %v188_v53 }
 0x12a   :  { %v266_v10 = vpop.f32.mrf.mxu1 }
 0x12b   :  { %v267_v11 = vadd.f32 %v819_v9, %v266_v10 }
 0x12d   :  { %v270_v12 = vmul.f32 0.2, %v267_v11 }
 0x12f   :  { %v271_v13 = vmax.f32 %v267_v11, %v270_v12 }
 0x131   :  { %v272_v14 = vpack.c.bf16 %v271_v13, %v271_v13 }
 0x132   :  { %v268_v15 = vpop.f32.mrf.mxu1 }
 0x133   :  { %383 = vmatmul.bf16.vlgmr.msra.gmra.mxu2 %v272_v14  ;;  %396 = vmatmul.bf16.vlgmr.msra.gmra.mxu3 %v272_v14 }
 0x1b6   :  { %v384_v27 = vpop.f32.mrf.mxu2  ;;  %v397_v28 = vpop.f32.mrf.mxu3 }
 0x1b7   :  { %v385_v29 = vadd.f32 %v384_v27, %v291_v25  ;;  %v398_v30 = vadd.f32 %v397_v28, %v292_v26 }
 0x1b9   :  { %401 = vst [vmem:[%s1164_s12] sm:$0xff] %v385_v29  ;;  %v402_v31 = vmul.f32 0.2, %v398_v30 }
 0x1bb   :  { %v403_v32 = vmax.f32 %v398_v30, %v402_v31 }
 0x1bd   :  { %v404_v33 = vpack.c.bf16 %v403_v32, %v403_v32 }
 0x1be   :  { %v386_v34 = vpop.f32.mrf.mxu2  ;;  %v399_v35 = vpop.f32.mrf.mxu3 }
 0x1bf   :  { %481 = vmatmul.bf16.vlgmr.msrb.gmra.mxu0 %v404_v33 }
 0x23c   :  { %v482_v39 = vpop.f32.mrf.mxu0 }
 0x23d   :  { %v483_v40 = vadd.f32 %v820_v38, %v482_v39 }
 0x23f   :  { %v486_v41 = vmul.f32 0.2, %v483_v40 }
 0x241   :  { %v487_v42 = vmax.f32 %v483_v40, %v486_v41 }
 0x243   :  { %v488_v43 = vpack.c.bf16 %v487_v42, %v487_v42 }
 0x244   :  { %v484_v44 = vpop.f32.mrf.mxu0 }
 0x245   :  { %565 = vmatmul.bf16.vlgmr.msrb.gmra.mxu1 %v488_v43 }
 0x2c2   :  { %v566_v46 = vpop.f32.mrf.mxu1 }
 0x2c3   :  { %v567_v47 = vadd.f32 %v821_v45, %v566_v46 }
 0x2c5   :  { %570 = vst [vmem:[#allocation14] sm:$0xff] %v567_v47 }
 0x2c6   :  { %581 = dma.vmem_to_hbm [thread:$0]  %s577_s23, 128, %s579_s25, [#allocation4]  }
 0x2ca   :  { %v568_v48 = vpop.f32.mrf.mxu1 }
 0x2cb   :  { %1022 = dma.done.wait [#allocation4], 128  }
 0x2cc   :  { %1023 = vsyncadd [#allocation4], 4294967168 }
 0x2cd   :  { %590 = vsyncpa [#allocation3], 1 }
 0x2ce   :  { %591 = vsyncpa [#allocation6], 1 }
 0x2cf   :  { %592 = vsyncpa [#allocation9], 1 }
 0x2d0   :  { %593 = vsyncpa [#allocation12], 1 }
 0x2d1   :  { %594 = vsyncpa [#allocation4], 1 }

</bundles_post_ra>
